<compile_context>
chip_gen: v7x
topology: tpu7x:2x2x1
jax: 0.10.0
libtpu: 0.0.40
codegen_flags: <defaults>
</compile_context>

<pallas_src>
import functools

import jax
import jax.numpy as jnp
import numpy as np
from jax import lax
from jax.experimental import pallas as pl
from jax.experimental.pallas import tpu as pltpu


# ----------------------------------------------------------------------------
# Pallas kernel: runs all N ADMM layers in a single kernel invocation.
# ----------------------------------------------------------------------------
def _admm_nn_kernel(Wt_ref, b_ref, l_ref, u_ref, x0_ref,
                    x_out_ref, snap_ref, *, n_layers, idx1, idx2):
    n = x0_ref.shape[1]
    b = b_ref[...]            # (1, n) row bias
    lr = l_ref[...]           # (1, n) lower bounds (values outside clamp block unused)
    ur = u_ref[...]           # (1, n) upper bounds (values outside clamp block unused)

    # Static lane mask selecting the clamp block [idx1, idx2).
    col = lax.broadcasted_iota(jnp.int32, (1, n), 1)
    clamp_mask = (col >= idx1) & (col < idx2)

    def layer(x):
        # Row layout: y_row = x_row @ W^T  ==  (W @ x_col)^T.
        # Wt is read from VMEM inside the body (no whole-matrix vreg hoist).
        y = jnp.dot(x, Wt_ref[...], preferred_element_type=jnp.float32) + b
        yc = jnp.minimum(jnp.maximum(y, lr), ur)
        return jnp.where(clamp_mask, yc, y)

    x = x0_ref[...]           # (1, n)

    # First N-1 layers: strict sequential dependence; short fixed trip count ->
    # unroll for LLO scheduler visibility across layers.
    x = lax.fori_loop(0, n_layers - 1, lambda i, xv: layer(xv), x, unroll=True)

    # Lane-dense snapshot just before the last layer (prev_z is sliced out of
    # this row in the wrapper), exactly like ADMM_NN.forward at idx == N - 1.
    snap_ref[...] = x

    # Last layer.
    x_out_ref[...] = layer(x)


# ----------------------------------------------------------------------------
# Wrapper (glue): parameter plumbing + pallas_call.
# ----------------------------------------------------------------------------
def admm_nn_forward(W, b, l, u, x0, *, n_layers, nx, nc):
    n = nx + 2 * nc
    idx1, idx2 = nx + nc, nx + 2 * nc
    dtype = W.dtype
    itemsize = np.dtype(dtype).itemsize

    # Row-layout parameters.  For a real MPC loop with fixed W/b/l/u these
    # should be precomputed once outside the per-timestep call path.
    Wt = W.T                                            # (n, n)
    b_row = b.reshape(1, n)
    l_row = jnp.zeros((1, n), dtype).at[0, idx1:idx2].set(l)
    u_row = jnp.zeros((1, n), dtype).at[0, idx1:idx2].set(u)
    x_row = x0.reshape(1, n)

    # Explicit VMEM budget: whole W^T resident + small row vectors, with
    # headroom, capped at the v7x physical 64 MiB.  For n beyond that cap the
    # right move is a grid over output rows with an accumulator (not needed at
    # these problem sizes).
    needed = itemsize * (n * n + 8 * n)
    vmem_limit = int(min(64 * 2**20, max(16 * 2**20, 4 * needed)))

    kernel = functools.partial(
        _admm_nn_kernel, n_layers=n_layers, idx1=idx1, idx2=idx2)

    vmem = pl.BlockSpec(memory_space=pltpu.MemorySpace.VMEM)
    x_out, snap = pl.pallas_call(
        kernel,
        out_shape=(jax.ShapeDtypeStruct((1, n), dtype),
                   jax.ShapeDtypeStruct((1, n), dtype)),
        in_specs=[vmem] * 5,
        out_specs=(vmem, vmem),
        compiler_params=pltpu.CompilerParams(vmem_limit_bytes=vmem_limit),
    )(Wt, b_row, l_row, u_row, x_row)

    return x_out.reshape(n), snap[0, idx1:idx2]


# ----------------------------------------------------------------------------
# Pure-JAX reference (mirrors the torch loop) for correctness checking.
# ----------------------------------------------------------------------------
def _reference_forward(W, b, l, u, x, n_layers, idx1, idx2):
    prev_z = None
    for i in range(n_layers):
        if i == n_layers - 1:
            prev_z = x[idx1:idx2]
        x = W @ x + b
        x = x.at[idx1:idx2].set(jnp.clip(x[idx1:idx2], l, u))
    return x, prev_z


# ----------------------------------------------------------------------------
# Deterministic parameter construction mirroring ADMM_NN.update_rho().
# ----------------------------------------------------------------------------
def build_admm_params(key, nx, nc, rho):
    kG, kT, ke, kq = jax.random.split(key, 4)
    G = 0.1 * jax.random.normal(kG, (nc, nx), dtype=jnp.float32)
    T = 0.1 * jax.random.normal(kT, (nx, nx), dtype=jnp.float32)
    eigs = jnp.abs(jax.random.normal(ke, (nx,), dtype=jnp.float32))
    q = jax.random.normal(kq, (nx,), dtype=jnp.float32)

    S = jnp.diag(1.0 / (rho * eigs + 1.0))
    D = T @ S @ T.T
    DGt = D @ G.T                      # (nx, nc)
    GDGt = G @ DGt                     # (nc, nc)
    I_nc = jnp.eye(nc, dtype=jnp.float32)
    I_nx = jnp.eye(nx, dtype=jnp.float32)

    W = jnp.concatenate([
        jnp.concatenate([I_nc, rho * G, -rho * I_nc], axis=1),
        jnp.concatenate([-DGt, -rho * DGt @ G, 2.0 * rho * DGt], axis=1),
        jnp.concatenate([(1.0 / rho) * I_nc - GDGt,
                         G @ (I_nx - rho * DGt @ G),
                         2.0 * rho * GDGt - I_nc], axis=1),
    ], axis=0)

    Dq = -D @ q
    b = jnp.concatenate([jnp.zeros((nc,), dtype=jnp.float32), Dq, G @ Dq])
    return W, b


if __name__ == "__main__":
    # Small, deterministic problem: nx=8 decision vars, nc=12 constraints,
    # state dim n = nx + 2*nc = 32, N = 10 ADMM layers.
    nx, nc, N = 8, 12, 10
    n = nx + 2 * nc
    idx1, idx2 = nx + nc, nx + 2 * nc
    rho = 1.0

    key = jax.random.PRNGKey(0)
    kp, kl, kx = jax.random.split(key, 3)

    W, b = build_admm_params(kp, nx, nc, rho)
    bound = jnp.abs(jax.random.normal(kl, (nc,), dtype=jnp.float32)) + 0.1
    l = -bound
    u = bound
    x0 = jax.random.normal(kx, (n,), dtype=jnp.float32)

    x_out, prev_z = admm_nn_forward(W, b, l, u, x0, n_layers=N, nx=nx, nc=nc)
    x_out = jax.block_until_ready(x_out)
    prev_z = jax.block_until_ready(prev_z)

    x_ref, prev_z_ref = _reference_forward(W, b, l, u, x0, N, idx1, idx2)

    np.testing.assert_allclose(np.asarray(x_out), np.asarray(x_ref),
                               rtol=1e-4, atol=1e-4)
    np.testing.assert_allclose(np.asarray(prev_z), np.asarray(prev_z_ref),
                               rtol=1e-4, atol=1e-4)

    print("KERNEL_OK")
</pallas_src>

<mosaic_0001>
module attributes {stable_mosaic.version = 11 : i64} {
  func.func @_admm_nn_kernel(%arg0: memref<32x32xf32, #tpu.memory_space<vmem>>, %arg1: memref<1x32xf32, #tpu.memory_space<vmem>>, %arg2: memref<1x32xf32, #tpu.memory_space<vmem>>, %arg3: memref<1x32xf32, #tpu.memory_space<vmem>>, %arg4: memref<1x32xf32, #tpu.memory_space<vmem>>, %arg5: memref<1x32xf32, #tpu.memory_space<vmem>>, %arg6: memref<1x32xf32, #tpu.memory_space<vmem>>) attributes {dimension_semantics = [], scalar_prefetch = 0 : i64, scratch_operands = 0 : i64, tpu.core_type = #tpu.core_type<tc>} {
    %c0 = arith.constant 0 : index
    %c0_0 = arith.constant 0 : index
    %0 = vector.load %arg1[%c0, %c0_0] : memref<1x32xf32, #tpu.memory_space<vmem>>, vector<1x32xf32>
    %c0_1 = arith.constant 0 : index
    %c0_2 = arith.constant 0 : index
    %1 = vector.load %arg2[%c0_1, %c0_2] : memref<1x32xf32, #tpu.memory_space<vmem>>, vector<1x32xf32>
    %c0_3 = arith.constant 0 : index
    %c0_4 = arith.constant 0 : index
    %2 = vector.load %arg3[%c0_3, %c0_4] : memref<1x32xf32, #tpu.memory_space<vmem>>, vector<1x32xf32>
    %3 = tpu.iota {dimensions = array<i32: 1>} : vector<1x32xi32>
    %c20_i32 = arith.constant 20 : i32
    %4 = vector.broadcast %c20_i32 : i32 to vector<1x32xi32>
    %5 = arith.cmpi sge, %3, %4 : vector<1x32xi32>
    %c32_i32 = arith.constant 32 : i32
    %6 = vector.broadcast %c32_i32 : i32 to vector<1x32xi32>
    %7 = arith.cmpi slt, %3, %6 : vector<1x32xi32>
    %8 = arith.andi %5, %7 : vector<1x32xi1>
    %c0_5 = arith.constant 0 : index
    %c0_6 = arith.constant 0 : index
    %9 = vector.load %arg4[%c0_5, %c0_6] : memref<1x32xf32, #tpu.memory_space<vmem>>, vector<1x32xf32>
    %c0_i32 = arith.constant 0 : i32
    %c0_7 = arith.constant 0 : index
    %c0_8 = arith.constant 0 : index
    %10 = vector.load %arg0[%c0_7, %c0_8] : memref<32x32xf32, #tpu.memory_space<vmem>>, vector<32x32xf32>
    %cst = arith.constant dense<0.000000e+00> : vector<1x32xf32>
    %11 = tpu.matmul %9, %10, %cst {dimension_numbers = #tpu.dot_dimension_numbers<[1], [0], [0], [1], [0, 0, 1, 1], [], []>} : vector<1x32xf32>, vector<32x32xf32>, vector<1x32xf32> -> vector<1x32xf32>
    %12 = arith.addf %11, %0 : vector<1x32xf32>
    %13 = arith.maximumf %12, %1 : vector<1x32xf32>
    %14 = arith.minimumf %13, %2 : vector<1x32xf32>
    %15 = arith.select %8, %14, %12 : vector<1x32xi1>, vector<1x32xf32>
    %c1_i32 = arith.constant 1 : i32
    %c0_9 = arith.constant 0 : index
    %c0_10 = arith.constant 0 : index
    %16 = vector.load %arg0[%c0_9, %c0_10] : memref<32x32xf32, #tpu.memory_space<vmem>>, vector<32x32xf32>
    %cst_11 = arith.constant dense<0.000000e+00> : vector<1x32xf32>
    %17 = tpu.matmul %15, %16, %cst_11 {dimension_numbers = #tpu.dot_dimension_numbers<[1], [0], [0], [1], [0, 0, 1, 1], [], []>} : vector<1x32xf32>, vector<32x32xf32>, vector<1x32xf32> -> vector<1x32xf32>
    %18 = arith.addf %17, %0 : vector<1x32xf32>
    %19 = arith.maximumf %18, %1 : vector<1x32xf32>
    %20 = arith.minimumf %19, %2 : vector<1x32xf32>
    %21 = arith.select %8, %20, %18 : vector<1x32xi1>, vector<1x32xf32>
    %c2_i32 = arith.constant 2 : i32
    %c0_12 = arith.constant 0 : index
    %c0_13 = arith.constant 0 : index
    %22 = vector.load %arg0[%c0_12, %c0_13] : memref<32x32xf32, #tpu.memory_space<vmem>>, vector<32x32xf32>
    %cst_14 = arith.constant dense<0.000000e+00> : vector<1x32xf32>
    %23 = tpu.matmul %21, %22, %cst_14 {dimension_numbers = #tpu.dot_dimension_numbers<[1], [0], [0], [1], [0, 0, 1, 1], [], []>} : vector<1x32xf32>, vector<32x32xf32>, vector<1x32xf32> -> vector<1x32xf32>
    %24 = arith.addf %23, %0 : vector<1x32xf32>
    %25 = arith.maximumf %24, %1 : vector<1x32xf32>
    %26 = arith.minimumf %25, %2 : vector<1x32xf32>
    %27 = arith.select %8, %26, %24 : vector<1x32xi1>, vector<1x32xf32>
    %c3_i32 = arith.constant 3 : i32
    %c0_15 = arith.constant 0 : index
    %c0_16 = arith.constant 0 : index
    %28 = vector.load %arg0[%c0_15, %c0_16] : memref<32x32xf32, #tpu.memory_space<vmem>>, vector<32x32xf32>
    %cst_17 = arith.constant dense<0.000000e+00> : vector<1x32xf32>
    %29 = tpu.matmul %27, %28, %cst_17 {dimension_numbers = #tpu.dot_dimension_numbers<[1], [0], [0], [1], [0, 0, 1, 1], [], []>} : vector<1x32xf32>, vector<32x32xf32>, vector<1x32xf32> -> vector<1x32xf32>
    %30 = arith.addf %29, %0 : vector<1x32xf32>
    %31 = arith.maximumf %30, %1 : vector<1x32xf32>
    %32 = arith.minimumf %31, %2 : vector<1x32xf32>
    %33 = arith.select %8, %32, %30 : vector<1x32xi1>, vector<1x32xf32>
    %c4_i32 = arith.constant 4 : i32
    %c0_18 = arith.constant 0 : index
    %c0_19 = arith.constant 0 : index
    %34 = vector.load %arg0[%c0_18, %c0_19] : memref<32x32xf32, #tpu.memory_space<vmem>>, vector<32x32xf32>
    %cst_20 = arith.constant dense<0.000000e+00> : vector<1x32xf32>
    %35 = tpu.matmul %33, %34, %cst_20 {dimension_numbers = #tpu.dot_dimension_numbers<[1], [0], [0], [1], [0, 0, 1, 1], [], []>} : vector<1x32xf32>, vector<32x32xf32>, vector<1x32xf32> -> vector<1x32xf32>
    %36 = arith.addf %35, %0 : vector<1x32xf32>
    %37 = arith.maximumf %36, %1 : vector<1x32xf32>
    %38 = arith.minimumf %37, %2 : vector<1x32xf32>
    %39 = arith.select %8, %38, %36 : vector<1x32xi1>, vector<1x32xf32>
    %c5_i32 = arith.constant 5 : i32
    %c0_21 = arith.constant 0 : index
    %c0_22 = arith.constant 0 : index
    %40 = vector.load %arg0[%c0_21, %c0_22] : memref<32x32xf32, #tpu.memory_space<vmem>>, vector<32x32xf32>
    %cst_23 = arith.constant dense<0.000000e+00> : vector<1x32xf32>
    %41 = tpu.matmul %39, %40, %cst_23 {dimension_numbers = #tpu.dot_dimension_numbers<[1], [0], [0], [1], [0, 0, 1, 1], [], []>} : vector<1x32xf32>, vector<32x32xf32>, vector<1x32xf32> -> vector<1x32xf32>
    %42 = arith.addf %41, %0 : vector<1x32xf32>
    %43 = arith.maximumf %42, %1 : vector<1x32xf32>
    %44 = arith.minimumf %43, %2 : vector<1x32xf32>
    %45 = arith.select %8, %44, %42 : vector<1x32xi1>, vector<1x32xf32>
    %c6_i32 = arith.constant 6 : i32
    %c0_24 = arith.constant 0 : index
    %c0_25 = arith.constant 0 : index
    %46 = vector.load %arg0[%c0_24, %c0_25] : memref<32x32xf32, #tpu.memory_space<vmem>>, vector<32x32xf32>
    %cst_26 = arith.constant dense<0.000000e+00> : vector<1x32xf32>
    %47 = tpu.matmul %45, %46, %cst_26 {dimension_numbers = #tpu.dot_dimension_numbers<[1], [0], [0], [1], [0, 0, 1, 1], [], []>} : vector<1x32xf32>, vector<32x32xf32>, vector<1x32xf32> -> vector<1x32xf32>
    %48 = arith.addf %47, %0 : vector<1x32xf32>
    %49 = arith.maximumf %48, %1 : vector<1x32xf32>
    %50 = arith.minimumf %49, %2 : vector<1x32xf32>
    %51 = arith.select %8, %50, %48 : vector<1x32xi1>, vector<1x32xf32>
    %c7_i32 = arith.constant 7 : i32
    %c0_27 = arith.constant 0 : index
    %c0_28 = arith.constant 0 : index
    %52 = vector.load %arg0[%c0_27, %c0_28] : memref<32x32xf32, #tpu.memory_space<vmem>>, vector<32x32xf32>
    %cst_29 = arith.constant dense<0.000000e+00> : vector<1x32xf32>
    %53 = tpu.matmul %51, %52, %cst_29 {dimension_numbers = #tpu.dot_dimension_numbers<[1], [0], [0], [1], [0, 0, 1, 1], [], []>} : vector<1x32xf32>, vector<32x32xf32>, vector<1x32xf32> -> vector<1x32xf32>
    %54 = arith.addf %53, %0 : vector<1x32xf32>
    %55 = arith.maximumf %54, %1 : vector<1x32xf32>
    %56 = arith.minimumf %55, %2 : vector<1x32xf32>
    %57 = arith.select %8, %56, %54 : vector<1x32xi1>, vector<1x32xf32>
    %c8_i32 = arith.constant 8 : i32
    %c0_30 = arith.constant 0 : index
    %c0_31 = arith.constant 0 : index
    %58 = vector.load %arg0[%c0_30, %c0_31] : memref<32x32xf32, #tpu.memory_space<vmem>>, vector<32x32xf32>
    %cst_32 = arith.constant dense<0.000000e+00> : vector<1x32xf32>
    %59 = tpu.matmul %57, %58, %cst_32 {dimension_numbers = #tpu.dot_dimension_numbers<[1], [0], [0], [1], [0, 0, 1, 1], [], []>} : vector<1x32xf32>, vector<32x32xf32>, vector<1x32xf32> -> vector<1x32xf32>
    %60 = arith.addf %59, %0 : vector<1x32xf32>
    %61 = arith.maximumf %60, %1 : vector<1x32xf32>
    %62 = arith.minimumf %61, %2 : vector<1x32xf32>
    %63 = arith.select %8, %62, %60 : vector<1x32xi1>, vector<1x32xf32>
    %c0_33 = arith.constant 0 : index
    %c0_34 = arith.constant 0 : index
    %64 = vector.load %arg6[%c0_33, %c0_34] : memref<1x32xf32, #tpu.memory_space<vmem>>, vector<1x32xf32>
    tpu.vector_store %arg6[%c0_33, %c0_34], %63 {strides = array<i32>} : memref<1x32xf32, #tpu.memory_space<vmem>>, vector<1x32xf32>,
    %c0_35 = arith.constant 0 : index
    %c0_36 = arith.constant 0 : index
    %65 = vector.load %arg0[%c0_35, %c0_36] : memref<32x32xf32, #tpu.memory_space<vmem>>, vector<32x32xf32>
    %cst_37 = arith.constant dense<0.000000e+00> : vector<1x32xf32>
    %66 = tpu.matmul %63, %65, %cst_37 {dimension_numbers = #tpu.dot_dimension_numbers<[1], [0], [0], [1], [0, 0, 1, 1], [], []>} : vector<1x32xf32>, vector<32x32xf32>, vector<1x32xf32> -> vector<1x32xf32>
    %67 = arith.addf %66, %0 : vector<1x32xf32>
    %68 = arith.maximumf %67, %1 : vector<1x32xf32>
    %69 = arith.minimumf %68, %2 : vector<1x32xf32>
    %70 = arith.select %8, %69, %67 : vector<1x32xi1>, vector<1x32xf32>
    %c0_38 = arith.constant 0 : index
    %c0_39 = arith.constant 0 : index
    %71 = vector.load %arg5[%c0_38, %c0_39] : memref<1x32xf32, #tpu.memory_space<vmem>>, vector<1x32xf32>
    tpu.vector_store %arg5[%c0_38, %c0_39], %70 {strides = array<i32>} : memref<1x32xf32, #tpu.memory_space<vmem>>, vector<1x32xf32>,
    return
  }
}

</mosaic_0001>

<bundles_post_ra>
// kernel: tpu_custom_call.1
= control target key start
LH: loop header
LB: loop body
LE: loop exit
PB: predicated region body
PF: predicated region fallthrough
CT: control target
= control target key end

     0   :  { %12 = vsyncpa [#allocation3], 0  ;;  %s1385_s0 = inlined_call_operand.hbm [shape: f32[32,32], index: 0, kind: input, shape index: {}]   ;;  %s1386_s1 = inlined_call_operand.vmem [shape: f32[1,32], index: 1, kind: input, shape index: {}]   ;;  %s1387_s2 = inlined_call_operand.vmem [shape: f32[1,32], index: 2, kind: input, shape index: {}]   ;;  %s1388_s3 = inlined_call_operand.vmem [shape: f32[1,32], index: 3, kind: input, shape index: {}]   ;;  %s1389_s4 = inlined_call_operand.vmem [shape: f32[1,32], index: 4, kind: input, shape index: {}]   ;;  %s1390_s5 = inlined_call_operand.hbm [shape: f32[1,32], index: 5, kind: output, shape index: {0}]   ;;  %s1391_s6 = inlined_call_operand.hbm [shape: f32[1,32], index: 6, kind: output, shape index: {1}]  }
   0x1   :  { %13 = vsyncpa [#allocation4], 0 }
   0x2   :  { %14 = vsyncpa [#allocation7], 0  ;;  %s1158_s21 = smov [#allocation2]   ;;  %s1086_s25 = scalar_lea.hbm %s1385_s0, 512 }
   0x3   :  { %s20_s22 = sshll.u32 %s1158_s21, 4  ;;  %p1087_p0 = scmp.ne.s32.totalorder %s1385_s0, %s1086_s25  ;;  %s21_s22 = int_to_ptr.vmem [resolvable:$true] %s20_s22 }
   0x4   :  { %p1090_p1 = scmp.lt.u32.totalorder %s1086_s25, %s1385_s0 }
   0x6   :  { %p1092_p2 = pnand %p1090_p1, %p1087_p0 }
   0x8   :  { %1095 = shalt.err (!%p1092_p2)
}
   0x9   :  { %s1096_s30 = scalar_lea.vmem %s21_s22, 512  ;;  %p1101_p4 = scmp.lt.s32.totalorder %s21_s22, %s21_s22 }
   0xa   :  { %p1097_p3 = scmp.ne.s32.totalorder %s21_s22, %s1096_s30  ;;  %p1102_p5 = scmp.lt.s32.totalorder %s1096_s30, %s1096_s30 }
   0xc   :  { %p1103_p6 = por %p1102_p5, %p1101_p4 }
   0xe   :  { %p1104_p7 = pnand %p1103_p6, %p1097_p3 }
  0x10   :  { %1107 = shalt.err (!%p1104_p7)
}
  0x11   :  { %s1159_s7 = smov 128   ;;  %s1160_s8 = smov 8  }
  0x12   :  { %26 = dma.hbm_to_vmem [thread:$0]  %s1385_s0, 512, %s21_s22, [#allocation3], %s1159_s7, %s1159_s7, %s1160_s8  }
  0x13   :  { %1152 = dma.done.wait [#allocation3], 512  }
  0x14   :  { %1153 = vsyncadd [#allocation3], 4294966784  ;;  %v1161_v0 = vmov 0.0|0.0   ;;  %vm1162_vm0 = vmmov 0   ;;  %v1163_v1 = vmov 0.0   ;;  %v47_v2 = vld [vmem:[#allocation2] sm:$0xff]  ;;  %v41_v9 = vlaneseq }
  0x15   :  { %1018 = vmatprep.subr.bf16.mxu0 %v1161_v0  ;;  %916 = vmatprep.mubr.msk.f32.mxu0 %vm1162_vm0, %v1163_v1  ;;  %v48_v3 = vld [vmem:[#allocation2 + $0x8] sm:$0xff]  ;;  %v49_v4 = vld [vmem:[#allocation2 + $0x10] sm:$0xff]  ;;  %v50_v6 = vld [vmem:[#allocation2 + $0x18] sm:$0xff]  ;;  %vm51_vm1 = vcmask 261120   ;;  %vm736_vm5 = vcmask 253952  }
  0x16   :  { %1024 = vmatprep.subr.bf16.mxu1 %v1161_v0  ;;  %927 = vmatprep.mubr.msk.f32.mxu1 %vm1162_vm0, %v1163_v1  ;;  %v1219_v5 = vpack.c.bf16 %v48_v3, %v47_v2  ;;  %v1222_v7 = vpack.c.bf16 %v50_v6, %v49_v4  ;;  %v46_v8 = vld [vmem:[%s1389_s4] sm:$0x1]  ;;  %v42_v10 = vand.u32 127, %v41_v9 }
  0x17   :  { %v1244_v11 = vld [vmem:[%s1386_s1] sm:$0x1]  ;;  %s1164_s1 = smov [#allocation6]  }
  0x18   :  { %1020 = vmatpush3.bf16.msra.mxu0 %v1219_v5  ;;  %1026 = vmatpush3.bf16.msra.mxu1 %v1219_v5  ;;  %v1249_v12 = vld [vmem:[%s1387_s2] sm:$0x1]  ;;  %vm43_vm2 = vcmp.ge.s32.totalorder %v42_v10, 20  ;;  %vm44_vm3 = vcmp.lt.s32.totalorder %v42_v10, 32  ;;  %s835_s2 = sshll.u32 %s1164_s1, 4  ;;  %s836_s2 = int_to_ptr.vmem [resolvable:$true] %s835_s2 }
  0x19   :  { %1021 = vmatprep.subr.bf16.mxu0 %v1161_v0  ;;  %1027 = vmatprep.subr.bf16.mxu1 %v1161_v0  ;;  %v1255_v16 = vld [vmem:[%s1388_s3] sm:$0x1]  ;;  %vm1258_vm4 = vmand %vm43_vm2, %vm44_vm3  ;;  %s1108_s3 = scalar_lea.vmem %s836_s2, 16  ;;  %s1112_s17 = scalar_lea.vmem %s836_s2, 32 }
  0x1a   :  { %p1109_p8 = scmp.ne.s32.totalorder %s836_s2, %s1108_s3  ;;  %p1113_p9 = scmp.lt.s32.totalorder %s836_s2, %s836_s2 }
  0x1b   :  { %p1114_p10 = scmp.lt.s32.totalorder %s1112_s17, %s1108_s3 }
  0x1c   :  { %1023 = vmatpush3.bf16.msra.mxu0 %v1222_v7  ;;  %1029 = vmatpush3.bf16.msra.mxu1 %v1222_v7 }
  0x1d   :  { %1030 = vmatprep.subr.bf16.mxu0 %v1161_v0  ;;  %1036 = vmatprep.subr.bf16.mxu1 %v1161_v0  ;;  %p1115_p11 = por %p1114_p10, %p1113_p9 }
  0x1f   :  { %917 = vmatmul.mubr.msk.f32.vlgmr.msra.gmra.mrb[0].mxu0 %vm51_vm1, %v46_v8  ;;  %p1116_p12 = pnand %p1115_p11, %p1109_p8 }
  0x20   :  { %1032 = vmatpush3.bf16.msra.mxu0 %v1219_v5  ;;  %938 = vmatprep.mubr.msk.f32.mxu0 %vm1162_vm0, %v1163_v1 }
  0x21   :  { %1033 = vmatprep.subr.bf16.mxu0 %v1161_v0 }
  0x24   :  { %1035 = vmatpush3.bf16.msra.mxu0 %v1222_v7 }
  0x25   :  { %1042 = vmatprep.subr.bf16.mxu0 %v1161_v0 }
  0xf2   :  { %v121_v13 = vpop.f32.mrb[0].mxu0 }
  0xf3   :  { %v122_v14 = vadd.f32 %v121_v13, %v1244_v11  ;;  %v918_v15 = vpop.f32.mrb[1].mxu0 }
  0xf5   :  { %v125_v17 = vmax.f32 %v122_v14, %v1249_v12 }
  0xf7   :  { %v126_v19 = vmin.f32 %v125_v17, %v1255_v16 }
  0xf9   :  { %v127_v20 = vsel %vm1258_vm4, %v126_v19, %v122_v14 }
  0xfa   :  { %928 = vmatmul.mubr.msk.f32.vlgmr.msra.gmra.mrb[0].mxu1 %vm51_vm1, %v127_v20 }
  0xfb   :  { %1038 = vmatpush3.bf16.msra.mxu1 %v1219_v5  ;;  %949 = vmatprep.mubr.msk.f32.mxu1 %vm1162_vm0, %v1163_v1 }
  0xfc   :  { %1039 = vmatprep.subr.bf16.mxu1 %v1161_v0 }
  0xff   :  { %1041 = vmatpush3.bf16.msra.mxu1 %v1222_v7 }
 0x100   :  { %1048 = vmatprep.subr.bf16.mxu1 %v1161_v0 }
 0x1cd   :  { %v197_v21 = vpop.f32.mrb[0].mxu1 }
 0x1ce   :  { %v198_v22 = vadd.f32 %v197_v21, %v1244_v11  ;;  %v929_v23 = vpop.f32.mrb[1].mxu1 }
 0x1d0   :  { %v201_v24 = vmax.f32 %v198_v22, %v1249_v12 }
 0x1d2   :  { %v202_v25 = vmin.f32 %v201_v24, %v1255_v16 }
 0x1d4   :  { %v203_v26 = vsel %vm1258_vm4, %v202_v25, %v198_v22 }
 0x1d5   :  { %939 = vmatmul.mubr.msk.f32.vlgmr.msra.gmra.mrb[2].mxu0 %vm51_vm1, %v203_v26 }
 0x1d6   :  { %1044 = vmatpush3.bf16.msra.mxu0 %v1219_v5  ;;  %960 = vmatprep.mubr.msk.f32.mxu0 %vm1162_vm0, %v1163_v1 }
 0x1d7   :  { %1045 = vmatprep.subr.bf16.mxu0 %v1161_v0 }
 0x1da   :  { %1047 = vmatpush3.bf16.msra.mxu0 %v1222_v7 }
 0x1db   :  { %1054 = vmatprep.subr.bf16.mxu0 %v1161_v0 }
 0x2a8   :  { %v273_v27 = vpop.f32.mrb[2].mxu0 }
 0x2a9   :  { %v274_v28 = vadd.f32 %v273_v27, %v1244_v11  ;;  %v940_v29 = vpop.f32.mrb[3].mxu0 }
 0x2ab   :  { %v277_v30 = vmax.f32 %v274_v28, %v1249_v12 }
 0x2ad   :  { %v278_v31 = vmin.f32 %v277_v30, %v1255_v16 }
 0x2af   :  { %v279_v32 = vsel %vm1258_vm4, %v278_v31, %v274_v28 }
 0x2b0   :  { %950 = vmatmul.mubr.msk.f32.vlgmr.msra.gmra.mrb[2].mxu1 %vm51_vm1, %v279_v32 }
 0x2b1   :  { %1050 = vmatpush3.bf16.msra.mxu1 %v1219_v5  ;;  %971 = vmatprep.mubr.msk.f32.mxu1 %vm1162_vm0, %v1163_v1 }
 0x2b2   :  { %1051 = vmatprep.subr.bf16.mxu1 %v1161_v0 }
 0x2b5   :  { %1053 = vmatpush3.bf16.msra.mxu1 %v1222_v7 }
 0x2b6   :  { %1060 = vmatprep.subr.bf16.mxu1 %v1161_v0 }
 0x383   :  { %v349_v33 = vpop.f32.mrb[2].mxu1 }
 0x384   :  { %v350_v34 = vadd.f32 %v349_v33, %v1244_v11  ;;  %v951_v35 = vpop.f32.mrb[3].mxu1 }
 0x386   :  { %v353_v36 = vmax.f32 %v350_v34, %v1249_v12 }
 0x388   :  { %v354_v37 = vmin.f32 %v353_v36, %v1255_v16 }
 0x38a   :  { %v355_v38 = vsel %vm1258_vm4, %v354_v37, %v350_v34 }
 0x38b   :  { %961 = vmatmul.mubr.msk.f32.vlgmr.msra.gmra.mrb[4].mxu0 %vm51_vm1, %v355_v38 }
 0x38c   :  { %1056 = vmatpush3.bf16.msra.mxu0 %v1219_v5  ;;  %982 = vmatprep.mubr.msk.f32.mxu0 %vm1162_vm0, %v1163_v1 }
 0x38d   :  { %1057 = vmatprep.subr.bf16.mxu0 %v1161_v0 }
 0x390   :  { %1059 = vmatpush3.bf16.msra.mxu0 %v1222_v7 }
 0x391   :  { %1066 = vmatprep.subr.bf16.mxu0 %v1161_v0 }
 0x45e   :  { %v425_v39 = vpop.f32.mrb[4].mxu0 }
 0x45f   :  { %v426_v40 = vadd.f32 %v425_v39, %v1244_v11  ;;  %v962_v41 = vpop.f32.mrb[5].mxu0 }
 0x461   :  { %v429_v42 = vmax.f32 %v426_v40, %v1249_v12 }
 0x463   :  { %v430_v43 = vmin.f32 %v429_v42, %v1255_v16 }
 0x465   :  { %v431_v44 = vsel %vm1258_vm4, %v430_v43, %v426_v40 }
 0x466   :  { %972 = vmatmul.mubr.msk.f32.vlgmr.msra.gmra.mrb[4].mxu1 %vm51_vm1, %v431_v44 }
 0x467   :  { %1062 = vmatpush3.bf16.msra.mxu1 %v1219_v5  ;;  %993 = vmatprep.mubr.msk.f32.mxu1 %vm1162_vm0, %v1163_v1 }
 0x468   :  { %1063 = vmatprep.subr.bf16.mxu1 %v1161_v0 }
 0x46b   :  { %1065 = vmatpush3.bf16.msra.mxu1 %v1222_v7 }
 0x46c   :  { %1072 = vmatprep.subr.bf16.mxu1 %v1161_v0 }
 0x539   :  { %v501_v45 = vpop.f32.mrb[4].mxu1 }
 0x53a   :  { %v502_v46 = vadd.f32 %v501_v45, %v1244_v11  ;;  %v973_v47 = vpop.f32.mrb[5].mxu1 }
 0x53c   :  { %v505_v48 = vmax.f32 %v502_v46, %v1249_v12 }
 0x53e   :  { %v506_v49 = vmin.f32 %v505_v48, %v1255_v16 }
 0x540   :  { %v507_v50 = vsel %vm1258_vm4, %v506_v49, %v502_v46 }
 0x541   :  { %983 = vmatmul.mubr.msk.f32.vlgmr.msra.gmra.mrb[6].mxu0 %vm51_vm1, %v507_v50 }
 0x542   :  { %1068 = vmatpush3.bf16.msra.mxu0 %v1219_v5  ;;  %1004 = vmatprep.mubr.msk.f32.mxu0 %vm1162_vm0, %v1163_v1 }
 0x543   :  { %1069 = vmatprep.subr.bf16.mxu0 %v1161_v0 }
 0x546   :  { %1071 = vmatpush3.bf16.msra.mxu0 %v1222_v7 }
 0x614   :  { %v577_v51 = vpop.f32.mrb[6].mxu0 }
 0x615   :  { %v578_v52 = vadd.f32 %v577_v51, %v1244_v11  ;;  %v984_v53 = vpop.f32.mrb[7].mxu0 }
 0x617   :  { %v581_v54 = vmax.f32 %v578_v52, %v1249_v12 }
 0x619   :  { %v582_v55 = vmin.f32 %v581_v54, %v1255_v16 }
 0x61b   :  { %v583_v56 = vsel %vm1258_vm4, %v582_v55, %v578_v52 }
 0x61c   :  { %994 = vmatmul.mubr.msk.f32.vlgmr.msra.gmra.mrb[6].mxu1 %vm51_vm1, %v583_v56 }
 0x61d   :  { %1074 = vmatpush3.bf16.msra.mxu1 %v1219_v5  ;;  %1015 = vmatprep.mubr.msk.f32.mxu1 %vm1162_vm0, %v1163_v1 }
 0x61e   :  { %1075 = vmatprep.subr.bf16.mxu1 %v1161_v0 }
 0x621   :  { %1077 = vmatpush3.bf16.msra.mxu1 %v1222_v7 }
 0x6ef   :  { %v653_v57 = vpop.f32.mrb[6].mxu1 }
 0x6f0   :  { %v654_v58 = vadd.f32 %v653_v57, %v1244_v11  ;;  %v995_v59 = vpop.f32.mrb[7].mxu1 }
 0x6f2   :  { %v657_v60 = vmax.f32 %v654_v58, %v1249_v12 }
 0x6f4   :  { %v658_v61 = vmin.f32 %v657_v60, %v1255_v16 }
 0x6f6   :  { %v659_v62 = vsel %vm1258_vm4, %v658_v61, %v654_v58 }
 0x6f7   :  { %1005 = vmatmul.mubr.msk.f32.vlgmr.msra.gmra.mrb[8].mxu0 %vm51_vm1, %v659_v62 }
 0x7ca   :  { %v729_v63 = vpop.f32.mrb[8].mxu0 }
 0x7cb   :  { %v730_v1 = vadd.f32 %v729_v63, %v1244_v11  ;;  %v1006_v2 = vpop.f32.mrb[9].mxu0 }
 0x7cd   :  { %v733_v0 = vmax.f32 %v730_v1, %v1249_v12 }
 0x7cf   :  { %v734_v3 = vmin.f32 %v733_v0, %v1255_v16 }
 0x7d1   :  { %v735_v4 = vsel %vm1258_vm4, %v734_v3, %v730_v1 }
 0x7d2   :  { %1016 = vmatmul.mubr.msk.f32.vlgmr.msra.gmra.mrb[8].mxu1 %vm51_vm1, %v735_v4  ;;  %737 = vst.msk [vmem:[#allocation6] sm:$0x1] %vm736_vm5, %v735_v4 }
 0x7d3   :  { %1119 = shalt.err (!%p1116_p12)
}
 0x7d4   :  { %s1120_s20 = scalar_lea.hbm %s1391_s6, 16 }
 0x7d5   :  { %p1121_p13 = scmp.ne.s32.totalorder %s1391_s6, %s1120_s20  ;;  %p1124_p0 = scmp.lt.u32.totalorder %s1120_s20, %s1391_s6 }
 0x7d7   :  { %p1126_p1 = pnand %p1124_p0, %p1121_p13 }
 0x7d9   :  { %1129 = shalt.err (!%p1126_p1)
}
 0x7da   :  { %838 = dma.vmem_to_hbm [thread:$0]  %s836_s2, 16, %s1391_s6, [#allocation7]  }
 0x7db   :  { %s1165_s27 = smov [#allocation5]  }
 0x7dc   :  { %s825_s28 = sshll.u32 %s1165_s27, 4  ;;  %s826_s28 = int_to_ptr.vmem [resolvable:$true] %s825_s28 }
 0x7dd   :  { %s1130_s29 = scalar_lea.vmem %s826_s28, 16  ;;  %s1134_s30 = scalar_lea.vmem %s826_s28, 32 }
 0x7de   :  { %p1131_p2 = scmp.ne.s32.totalorder %s826_s28, %s1130_s29  ;;  %p1135_p3 = scmp.lt.s32.totalorder %s826_s28, %s826_s28 }
 0x7df   :  { %p1136_p4 = scmp.lt.s32.totalorder %s1134_s30, %s1130_s29 }
 0x7e1   :  { %p1137_p5 = por %p1136_p4, %p1135_p3 }
 0x7e3   :  { %p1138_p6 = pnand %p1137_p5, %p1131_p2 }
 0x8a5   :  { %v811_v5 = vpop.f32.mrb[8].mxu1 }
 0x8a6   :  { %v812_v6 = vadd.f32 %v811_v5, %v1244_v11  ;;  %v1017_v7 = vpop.f32.mrb[9].mxu1 }
 0x8a8   :  { %v815_v8 = vmax.f32 %v812_v6, %v1249_v12 }
 0x8aa   :  { %v816_v9 = vmin.f32 %v815_v8, %v1255_v16 }
 0x8ac   :  { %v817_v10 = vsel %vm1258_vm4, %v816_v9, %v812_v6 }
 0x8ad   :  { %818 = vst.msk [vmem:[#allocation5] sm:$0x1] %vm736_vm5, %v817_v10 }
 0x8ae   :  { %1141 = shalt.err (!%p1138_p6)
}
 0x8af   :  { %s1142_s8 = scalar_lea.hbm %s1390_s5, 16 }
 0x8b0   :  { %p1143_p7 = scmp.ne.s32.totalorder %s1390_s5, %s1142_s8  ;;  %p1146_p8 = scmp.lt.u32.totalorder %s1142_s8, %s1390_s5 }
 0x8b2   :  { %p1148_p9 = pnand %p1146_p8, %p1143_p7 }
 0x8b4   :  { %1151 = shalt.err (!%p1148_p9)
}
 0x8b5   :  { %828 = dma.vmem_to_hbm [thread:$0]  %s826_s28, 16, %s1390_s5, [#allocation4]  }
 0x8b6   :  { %1154 = dma.done.wait [#allocation4], 16  }
 0x8b7   :  { %1155 = vsyncadd [#allocation4], 4294967280 }
 0x8b8   :  { %1156 = dma.done.wait [#allocation7], 16  }
 0x8b9   :  { %1157 = vsyncadd [#allocation7], 4294967280 }
 0x8ba   :  { %845 = vsyncpa [#allocation3], 1 }
 0x8bb   :  { %846 = vsyncpa [#allocation4], 1 }
 0x8bc   :  { %847 = vsyncpa [#allocation7], 1 }

</bundles_post_ra>
